<compile_context>
chip_gen: v6e
topology: v6e:2x2x1
jax: 0.10.0
libtpu: 0.0.40
codegen_flags: <defaults>
</compile_context>

<pallas_src>
import jax
import jax.numpy as jnp
from jax.experimental import pallas as pl
from jax.experimental.pallas import tpu as pltpu


def lyapunov_critic_kernel(xT_ref, w1T_ref, b1_ref, w2T_ref, b2_ref,
                           w3_ref, b3_ref, o_ref):
    xT = xT_ref[...]                                           # (D,  TB)
    h1 = jnp.tanh(
        jnp.dot(w1T_ref[...], xT, preferred_element_type=jnp.float32)
        + b1_ref[...])                                         # (H1, TB)
    h2 = jnp.tanh(
        jnp.dot(w2T_ref[...], h1, preferred_element_type=jnp.float32)
        + b2_ref[...])                                         # (H2, TB)
    # Final (H2 -> 1) layer: VPU multiply + sublane reduction (XLU) instead of
    # an M=1 matmul through the MXU.
    z = jnp.sum(h2 * w3_ref[...], axis=0, keepdims=True) + b3_ref[...]  # (1, TB)
    o_ref[...] = jax.nn.sigmoid(z)


def _round_up(v, m):
    return ((v + m - 1) // m) * m


def lyapunov_critic_forward(x, params, *, max_tile=32768):
    """x: (B, input_size) f32.  Returns (B,) f32 (sigmoid output, squeezed)."""
    w1, b1, w2, b2, w3, b3 = params
    B, D = x.shape
    H1 = w1.shape[1]
    H2 = w2.shape[1]

    # Lane-dense batch tile: multiple of 128, large enough to amortize the
    # per-grid-step overhead, but capped at ~ceil(B/2) so that whenever the
    # batch allows it there are >=2 grid steps (megacore sharding on v7x).
    half = _round_up(pl.cdiv(B, 2), 128)
    TB = max(128, min(max_tile, half))
    grid = (pl.cdiv(B, TB),)

    # Layout plumbing: batch on the lane axis. No explicit zero-pad — Pallas
    # handles the ragged last block; garbage lanes never mix and are sliced off.
    xT = x.T                          # (D, B)
    w1T = w1.T                        # (H1, D)
    w2T = w2.T                        # (H2, H1)
    b1c = b1.reshape(H1, 1)           # column biases broadcast across lanes
    b2c = b2.reshape(H2, 1)
    w3c = w3.reshape(H2, 1)
    b3c = b3.reshape(1, 1)

    out = pl.pallas_call(
        lyapunov_critic_kernel,
        out_shape=jax.ShapeDtypeStruct((1, B), jnp.float32),
        grid=grid,
        in_specs=[
            pl.BlockSpec((D, TB), lambda i: (0, i)),    # xT batch tile
            pl.BlockSpec((H1, D), lambda i: (0, 0)),    # W1^T   (VMEM-resident)
            pl.BlockSpec((H1, 1), lambda i: (0, 0)),    # b1
            pl.BlockSpec((H2, H1), lambda i: (0, 0)),   # W2^T
            pl.BlockSpec((H2, 1), lambda i: (0, 0)),    # b2
            pl.BlockSpec((H2, 1), lambda i: (0, 0)),    # w3 column
            pl.BlockSpec((1, 1), lambda i: (0, 0)),     # b3
        ],
        out_specs=pl.BlockSpec((1, TB), lambda i: (0, i)),
        compiler_params=pltpu.CompilerParams(
            dimension_semantics=("parallel",),
            vmem_limit_bytes=32 * 1024 * 1024,
            # Let XLA fuse the (B,D)->(D,B) transpose into the pallas_call's
            # first operand instead of materializing it in HBM.
            allow_input_fusion=[True, False, False, False, False, False, False],
        ),
    )(xT, w1T, b1c, w2T, b2c, w3c, b3c)
    return out[0, :B]   # squeeze(-1) glue


def init_params(key, input_size, hidden_sizes=(20, 20)):
    """Deterministic synthetic parameter init (same shapes as the nn.Module)."""
    sizes = (input_size,) + tuple(hidden_sizes) + (1,)
    params = []
    for i in range(len(sizes) - 1):
        key, kw, kb = jax.random.split(key, 3)
        fan_in, fan_out = sizes[i], sizes[i + 1]
        scale = 1.0 / jnp.sqrt(jnp.float32(fan_in))
        w = jax.random.uniform(kw, (fan_in, fan_out), jnp.float32,
                               minval=-scale, maxval=scale)
        b = jax.random.uniform(kb, (1, fan_out), jnp.float32,
                               minval=-scale, maxval=scale)
        params += [w, b]
    return tuple(params)


def reference_forward(x, params):
    """Plain-JAX reference for correctness checking."""
    w1, b1, w2, b2, w3, b3 = params
    h1 = jnp.tanh(x @ w1 + b1)
    h2 = jnp.tanh(h1 @ w2 + b2)
    return jax.nn.sigmoid(h2 @ w3 + b3)[:, 0]


# TODO(synk): forward_dreal (symbolic dReal expression construction) has no
# tensor/Pallas equivalent; only the numeric forward pass is implemented.


if __name__ == "__main__":
    key = jax.random.PRNGKey(0)
    key, kx = jax.random.split(key)

    batch = 8
    input_size = 4
    hidden_sizes = (20, 20)

    x = jax.random.normal(kx, (batch, input_size), jnp.float32)
    params = init_params(key, input_size, hidden_sizes)

    y = lyapunov_critic_forward(x, params)
    jax.block_until_ready(y)

    y_ref = reference_forward(x, params)
    assert y.shape == (batch,)
    assert jnp.allclose(y, y_ref, atol=1e-5, rtol=1e-5)

    # Also exercise a multi-tile (ragged last block) batch: with B=3000 the
    # tile logic picks TB=1536 -> 2 grid steps, last block partially valid.
    key, kx2 = jax.random.split(key)
    x_big = jax.random.normal(kx2, (3000, input_size), jnp.float32)
    y_big = lyapunov_critic_forward(x_big, params)
    jax.block_until_ready(y_big)
    assert y_big.shape == (3000,)
    assert jnp.allclose(y_big, reference_forward(x_big, params),
                        atol=1e-5, rtol=1e-5)

    print("KERNEL_OK")
</pallas_src>

<mosaic_0001>
module attributes {stable_mosaic.version = 11 : i64} {
  func.func @lyapunov_critic_kernel(%arg0: i32, %arg1: memref<4x128xf32, #tpu.memory_space<vmem>>, %arg2: memref<20x4xf32, #tpu.memory_space<vmem>>, %arg3: memref<20x1xf32, #tpu.memory_space<vmem>>, %arg4: memref<20x20xf32, #tpu.memory_space<vmem>>, %arg5: memref<20x1xf32, #tpu.memory_space<vmem>>, %arg6: memref<20x1xf32, #tpu.memory_space<vmem>>, %arg7: memref<1x1xf32, #tpu.memory_space<vmem>>, %arg8: memref<1x128xf32, #tpu.memory_space<vmem>>) attributes {dimension_semantics = [#tpu.dimension_semantics<parallel>], iteration_bounds = array<i64: 1>, scalar_prefetch = 0 : i64, scratch_operands = 0 : i64, tpu.core_type = #tpu.core_type<tc>, window_params = [{transform_indices = @transform_0, window_bounds = array<i64: 4, 128>}, {pipeline_mode = #tpu.pipeline_mode<synchronous>, transform_indices = @transform_1, window_bounds = array<i64: 20, 4>}, {pipeline_mode = #tpu.pipeline_mode<synchronous>, transform_indices = @transform_2, window_bounds = array<i64: 20, 1>}, {pipeline_mode = #tpu.pipeline_mode<synchronous>, transform_indices = @transform_3, window_bounds = array<i64: 20, 20>}, {pipeline_mode = #tpu.pipeline_mode<synchronous>, transform_indices = @transform_4, window_bounds = array<i64: 20, 1>}, {pipeline_mode = #tpu.pipeline_mode<synchronous>, transform_indices = @transform_5, window_bounds = array<i64: 20, 1>}, {pipeline_mode = #tpu.pipeline_mode<synchronous>, transform_indices = @transform_6, window_bounds = array<i64: 1, 1>}, {transform_indices = @transform_7, window_bounds = array<i64: 1, 128>}]} {
    %c0 = arith.constant 0 : index
    %c0_0 = arith.constant 0 : index
    %0 = vector.load %arg1[%c0, %c0_0] : memref<4x128xf32, #tpu.memory_space<vmem>>, vector<4x128xf32>
    %c0_1 = arith.constant 0 : index
    %c0_2 = arith.constant 0 : index
    %1 = vector.load %arg2[%c0_1, %c0_2] : memref<20x4xf32, #tpu.memory_space<vmem>>, vector<20x4xf32>
    %cst = arith.constant dense<0.000000e+00> : vector<20x128xf32>
    %2 = tpu.matmul %1, %0, %cst {dimension_numbers = #tpu.dot_dimension_numbers<[1], [0], [0], [1], [0, 0, 1, 1], [], []>} : vector<20x4xf32>, vector<4x128xf32>, vector<20x128xf32> -> vector<20x128xf32>
    %c0_3 = arith.constant 0 : index
    %c0_4 = arith.constant 0 : index
    %3 = vector.load %arg3[%c0_3, %c0_4] : memref<20x1xf32, #tpu.memory_space<vmem>>, vector<20x1xf32>
    %4 = vector.broadcast %3 : vector<20x1xf32> to vector<20x128xf32>
    %5 = arith.addf %2, %4 : vector<20x128xf32>
    %6 = math.tanh %5 : vector<20x128xf32>
    %c0_5 = arith.constant 0 : index
    %c0_6 = arith.constant 0 : index
    %7 = vector.load %arg4[%c0_5, %c0_6] : memref<20x20xf32, #tpu.memory_space<vmem>>, vector<20x20xf32>
    %cst_7 = arith.constant dense<0.000000e+00> : vector<20x128xf32>
    %8 = tpu.matmul %7, %6, %cst_7 {dimension_numbers = #tpu.dot_dimension_numbers<[1], [0], [0], [1], [0, 0, 1, 1], [], []>} : vector<20x20xf32>, vector<20x128xf32>, vector<20x128xf32> -> vector<20x128xf32>
    %c0_8 = arith.constant 0 : index
    %c0_9 = arith.constant 0 : index
    %9 = vector.load %arg5[%c0_8, %c0_9] : memref<20x1xf32, #tpu.memory_space<vmem>>, vector<20x1xf32>
    %10 = vector.broadcast %9 : vector<20x1xf32> to vector<20x128xf32>
    %11 = arith.addf %8, %10 : vector<20x128xf32>
    %12 = math.tanh %11 : vector<20x128xf32>
    %c0_10 = arith.constant 0 : index
    %c0_11 = arith.constant 0 : index
    %13 = vector.load %arg6[%c0_10, %c0_11] : memref<20x1xf32, #tpu.memory_space<vmem>>, vector<20x1xf32>
    %14 = vector.broadcast %13 : vector<20x1xf32> to vector<20x128xf32>
    %15 = arith.mulf %12, %14 : vector<20x128xf32>
    %cst_12 = arith.constant dense<0.000000e+00> : vector<128xf32>
    %16 = vector.multi_reduction <add>, %15, %cst_12 [0] : vector<20x128xf32> to vector<128xf32>
    %17 = vector.shape_cast %16 : vector<128xf32> to vector<1x128xf32>
    %c0_13 = arith.constant 0 : index
    %c0_14 = arith.constant 0 : index
    %18 = vector.load %arg7[%c0_13, %c0_14] : memref<1x1xf32, #tpu.memory_space<vmem>>, vector<1x1xf32>
    %19 = vector.broadcast %18 : vector<1x1xf32> to vector<1x128xf32>
    %20 = arith.addf %17, %19 : vector<1x128xf32>
    %21 = arith.negf %20 : vector<1x128xf32>
    %22 = math.exp %21 : vector<1x128xf32>
    %cst_15 = arith.constant 1.000000e+00 : f32
    %23 = vector.broadcast %cst_15 : f32 to vector<1x128xf32>
    %24 = arith.addf %23, %22 : vector<1x128xf32>
    %25 = arith.divf %23, %24 : vector<1x128xf32>
    %c0_16 = arith.constant 0 : index
    %c0_17 = arith.constant 0 : index
    %26 = vector.load %arg8[%c0_16, %c0_17] : memref<1x128xf32, #tpu.memory_space<vmem>>, vector<1x128xf32>
    tpu.vector_store %arg8[%c0_16, %c0_17], %25 {strides = array<i32>} : memref<1x128xf32, #tpu.memory_space<vmem>>, vector<1x128xf32>,
    return
  }
  func.func @transform_0(%arg0: i32) -> (i32, i32) {
    %c0_i32 = arith.constant 0 : i32
    %c0_i32_0 = arith.constant 0 : i32
    return %c0_i32, %arg0 : i32, i32
  }
  func.func @transform_1(%arg0: i32) -> (i32, i32) {
    %c0_i32 = arith.constant 0 : i32
    %c0_i32_0 = arith.constant 0 : i32
    %c0_i32_1 = arith.constant 0 : i32
    return %c0_i32, %c0_i32_0 : i32, i32
  }
  func.func @transform_2(%arg0: i32) -> (i32, i32) {
    %c0_i32 = arith.constant 0 : i32
    %c0_i32_0 = arith.constant 0 : i32
    %c0_i32_1 = arith.constant 0 : i32
    return %c0_i32, %c0_i32_0 : i32, i32
  }
  func.func @transform_3(%arg0: i32) -> (i32, i32) {
    %c0_i32 = arith.constant 0 : i32
    %c0_i32_0 = arith.constant 0 : i32
    %c0_i32_1 = arith.constant 0 : i32
    return %c0_i32, %c0_i32_0 : i32, i32
  }
  func.func @transform_4(%arg0: i32) -> (i32, i32) {
    %c0_i32 = arith.constant 0 : i32
    %c0_i32_0 = arith.constant 0 : i32
    %c0_i32_1 = arith.constant 0 : i32
    return %c0_i32, %c0_i32_0 : i32, i32
  }
  func.func @transform_5(%arg0: i32) -> (i32, i32) {
    %c0_i32 = arith.constant 0 : i32
    %c0_i32_0 = arith.constant 0 : i32
    %c0_i32_1 = arith.constant 0 : i32
    return %c0_i32, %c0_i32_0 : i32, i32
  }
  func.func @transform_6(%arg0: i32) -> (i32, i32) {
    %c0_i32 = arith.constant 0 : i32
    %c0_i32_0 = arith.constant 0 : i32
    %c0_i32_1 = arith.constant 0 : i32
    return %c0_i32, %c0_i32_0 : i32, i32
  }
  func.func @transform_7(%arg0: i32) -> (i32, i32) {
    %c0_i32 = arith.constant 0 : i32
    %c0_i32_0 = arith.constant 0 : i32
    return %c0_i32, %arg0 : i32, i32
  }
}

</mosaic_0001>

<bundles_post_ra>
// kernel: tpu_custom_call.1
= control target key start
LH: loop header
LB: loop body
LE: loop exit
PB: predicated region body
PF: predicated region fallthrough
CT: control target
= control target key end

     0   :  { %s536_s0 = inlined_call_operand.vmem [shape: f32[4,8], index: 0, kind: input, shape index: {}]   ;;  %s537_s1 = inlined_call_operand.vmem [shape: f32[20,4], index: 1, kind: input, shape index: {}]   ;;  %s538_s2 = inlined_call_operand.vmem [shape: f32[20,1], index: 2, kind: input, shape index: {}]   ;;  %s539_s3 = inlined_call_operand.vmem [shape: f32[20,20], index: 3, kind: input, shape index: {}]   ;;  %s540_s4 = inlined_call_operand.vmem [shape: f32[20,1], index: 4, kind: input, shape index: {}]   ;;  %s541_s5 = inlined_call_operand.vmem [shape: f32[20,1], index: 5, kind: input, shape index: {}]   ;;  %s542_s6 = inlined_call_operand.<no memory space> [shape: f32[1,1], index: 6, kind: input, shape index: {}]   ;;  %s543_s7 = inlined_call_operand.hbm [shape: f32[1,8], index: 7, kind: output, shape index: {}]  }
   0x1   :  { %v12_v0 = vstv %s542_s6 }
   0x2   :  { %13 = vst [vmem:[#allocation2] sm:$0x1] %v12_v0 }
   0x3   :  { %v29_v1 = vld [vmem:[%s536_s0] sm:$0xf]  ;;  %vm61_vm0 = vcmask 1043456   ;;  %v416_v3 = vmov 0.0   ;;  %vm417_vm1 = vmmov 0   ;;  %vm51_vm2 = vcmask 31744  }
   0x4   :  { %v30_v2 = vld [vmem:[%s537_s1] sm:$0xff]  ;;  %346 = vmatprep.subr.mxu0 %v416_v3  ;;  %348 = vmatprep.mubr.msk.f32.mxu0 %vm417_vm1, %v416_v3  ;;  %v418_v4 = vmov 0   ;;  %v35_v5 = vld [vmem:[%s538_s2 + $0x10] sm:$0xf]  ;;  %v31_v7 = vld [vmem:[%s537_s1 + $0x8] sm:$0xff] }
   0x5   :  { %347 = vmatpush3.msk.msra.mxu0 %vm61_vm0, %v29_v1  ;;  %376 = vset.pattern.permute.xlu0 %v418_v4  ;;  %v33_v6 = vld [vmem:[%s538_s2] sm:$0xff]  ;;  %v34_v8 = vld [vmem:[%s538_s2 + $0x8] sm:$0xff] }
   0x6   :  { %349 = vmatmul.mubr.msk.f32.vlgmr.msra.gmra.mxu0 %vm51_vm2, %v30_v2  ;;  %48 = vperm.xlu0 %376, %v35_v5  }
   0x7   :  { %351 = vmatprep.mubr.msk.f32.mxu0 %vm417_vm1, %v416_v3  ;;  %377 = vset.pattern.permute.xlu1 %v418_v4 }
   0x8   :  { %38 = vperm.xlu1 %377, %v33_v6   ;;  %357 = vmatprep.subr.mxu1 %v416_v3 }
   0x9   :  { %14 = vsyncpa [#allocation4], 0  ;;  %v151_v9 = vld [vmem:[%s540_s4] sm:$0xff]  ;;  %363 = vmatprep.mubr.msk.f32.mxu1 %vm417_vm1, %v416_v3  ;;  %v32_v10 = vld [vmem:[%s537_s1 + $0x10] sm:$0xf]  ;;  %vm169_vm3 = vcmask 162816   ;;  %v301_v58 = vlaneseq }
   0xa   :  { %352 = vmatmul.mubr.msk.f32.gmra.mxu0 %vm51_vm2, %v31_v7  ;;  %43 = vperm.xlu0 %376, %v34_v8   ;;  %v152_v11 = vld [vmem:[%s540_s4 + $0x8] sm:$0xff]  ;;  %v153_v12 = vld [vmem:[%s540_s4 + $0x10] sm:$0xf]  ;;  %v265_v13 = vld [vmem:[%s541_s5] sm:$0xff] }
   0xb   :  { %354 = vmatprep.mubr.msk.f32.mxu0 %vm417_vm1, %v416_v3  ;;  %v266_v14 = vld [vmem:[%s541_s5 + $0x8] sm:$0xff]  ;;  %v267_v15 = vld [vmem:[%s541_s5 + $0x10] sm:$0xf]  ;;  %v295_v16 = vld [vmem:[#allocation2] sm:$0x1]  ;;  %v302_v61 = vshrl.u32 %v301_v58, 7 }
   0xc   :  { %156 = vperm.xlu1 %377, %v151_v9   ;;  %v148_v31 = vld [vmem:[%s539_s3] sm:$0xff]  ;;  %v149_v33 = vld [vmem:[%s539_s3 + $0x8] sm:$0xff]  ;;  %v150_v34 = vld [vmem:[%s539_s3 + $0x10] sm:$0xf]  ;;  %s419_s3 = smov [#allocation3]  }
   0xd   :  { %v303_v0 = vsub.s32 0, %v302_v61  ;;  %s319_s29 = sshll.u32 %s419_s3, 4  ;;  %s320_s29 = int_to_ptr.vmem [resolvable:$true] %s319_s29 }
   0xe   :  { %355 = vmatmul.mubr.msk.f32.gmra.mxu0 %vm51_vm2, %v32_v10  ;;  %161 = vperm.xlu0 %376, %v152_v11   ;;  %s394_s6 = scalar_lea.vmem %s320_s29, 16  ;;  %s398_s30 = scalar_lea.vmem %s320_s29, 32 }
   0xf   :  { %p395_p0 = scmp.ne.s32.totalorder %s320_s29, %s394_s6  ;;  %p399_p1 = scmp.lt.s32.totalorder %s320_s29, %s320_s29 }
  0x10   :  { %166 = vperm.xlu1 %377, %v153_v12   ;;  %p400_p2 = scmp.lt.s32.totalorder %s398_s30, %s394_s6 }
  0x12   :  { %270 = vperm.xlu0 %376, %v265_v13   ;;  %p401_p3 = por %p400_p2, %p399_p1 }
  0x14   :  { %275 = vperm.xlu1 %377, %v266_v14   ;;  %p402_p4 = pnand %p401_p3, %p395_p0 }
  0x16   :  { %280 = vperm.xlu0 %376, %v267_v15  }
  0x18   :  { %298 = vperm.xlu1 %377, %v295_v16  }
  0x81   :  { %v49_v18 = vpop.permute.xlu0 %48 }
  0x83   :  { %v39_v26 = vpop.permute.xlu1 %38 }
  0x85   :  { %v44_v22 = vpop.permute.xlu0 %43 }
  0x87   :  { %v157_v36 = vpop.permute.xlu1 %156 }
  0x89   :  { %v162_v38 = vpop.permute.xlu0 %161 }
  0x8b   :  { %v167_v43 = vpop.permute.xlu1 %166 }
  0x8d   :  { %v271_v47 = vpop.permute.xlu0 %270 }
  0x8f   :  { %v276_v50 = vpop.permute.xlu1 %275 }
  0x91   :  { %v281_v53 = vpop.permute.xlu0 %280 }
  0x93   :  { %v299_v2 = vpop.permute.xlu1 %298 }
  0x94   :  { %v304_v4 = vrot.slane %v299_v2, %v303_v0 }
  0xc6   :  { %v131_v17 = vpop.f32.mrf.mxu0 }
  0xc7   :  { %v132_v28 = vadd.f32 %v131_v17, %v39_v26 }
  0xc8   :  { %v350_v19 = vpop.f32.mrf.mxu0 }
  0xca   :  { %v136_v20 = vpop.f32.mrf.mxu0 }
  0xcb   :  { %v137_v24 = vadd.f32 %v136_v20, %v44_v22 }
  0xcc   :  { %v353_v21 = vpop.f32.mrf.mxu0 }
  0xce   :  { %v141_v23 = vpop.f32.mrf.mxu0 }
  0xcf   :  { %v142_v25 = vadd.f32 %v141_v23, %v49_v18 }
  0xd0   :  { %v356_v27 = vpop.f32.mrf.mxu0 }
  0xd1   :  { %378 = vtanh.f32 %v142_v25 }
  0xd2   :  { %380 = vtanh.f32 %v137_v24 }
  0xd3   :  { %382 = vtanh.f32 %v132_v28 }
  0xde   :  { %v379_v29 = vpop.eup %378 }
  0xdf   :  { %358 = vmatpush3.msk.msra.mxu1 %vm61_vm0, %v379_v29  ;;  %v381_v30 = vpop.eup %380 }
  0xe0   :  { %359 = vmatprep.subr.mxu1 %v416_v3  ;;  %v383_v32 = vpop.eup %382 }
  0xe1   :  { %360 = vmatpush3.msra.mxu1 %v381_v30 }
  0xe2   :  { %361 = vmatprep.subr.mxu1 %v416_v3 }
  0xe3   :  { %362 = vmatpush3.msra.mxu1 %v383_v32 }
  0xe4   :  { %364 = vmatmul.mubr.msk.f32.vlgmr.msra.gmra.mxu1 %vm169_vm3, %v148_v31 }
  0xe5   :  { %366 = vmatprep.mubr.msk.f32.mxu1 %vm417_vm1, %v416_v3 }
  0xe8   :  { %367 = vmatmul.mubr.msk.f32.gmra.mxu1 %vm169_vm3, %v149_v33 }
  0xe9   :  { %369 = vmatprep.mubr.msk.f32.mxu1 %vm417_vm1, %v416_v3 }
  0xec   :  { %370 = vmatmul.mubr.msk.f32.gmra.mxu1 %vm169_vm3, %v150_v34 }
 0x1a4   :  { %v248_v35 = vpop.f32.mrf.mxu1 }
 0x1a5   :  { %v249_v39 = vadd.f32 %v248_v35, %v157_v36 }
 0x1a6   :  { %v365_v37 = vpop.f32.mrf.mxu1 }
 0x1a8   :  { %v253_v40 = vpop.f32.mrf.mxu1 }
 0x1a9   :  { %v254_v41 = vadd.f32 %v253_v40, %v162_v38 }
 0x1aa   :  { %v368_v42 = vpop.f32.mrf.mxu1 }
 0x1ab   :  { %384 = vtanh.f32 %v254_v41 }
 0x1ac   :  { %386 = vtanh.f32 %v249_v39  ;;  %v258_v44 = vpop.f32.mrf.mxu1 }
 0x1ad   :  { %v259_v45 = vadd.f32 %v258_v44, %v167_v43 }
 0x1ae   :  { %v371_v46 = vpop.f32.mrf.mxu1 }
 0x1af   :  { %388 = vtanh.f32 %v259_v45 }
 0x1b8   :  { %v385_v48 = vpop.eup %384 }
 0x1b9   :  { %v387_v49 = vpop.eup %386  ;;  %v284_v51 = vmul.f32 %v385_v48, %v276_v50 }
 0x1ba   :  { %v283_v54 = vmul.f32 %v387_v49, %v271_v47 }
 0x1bc   :  { %v389_v52 = vpop.eup %388  ;;  %v286_v56 = vadd.f32 %v284_v51, %v283_v54 }
 0x1bd   :  { %v285_v55 = vmul.f32 %v389_v52, %v281_v53 }
 0x1bf   :  { %v287_v57 = vsel %vm61_vm0, %v285_v55, 0.0 }
 0x1c0   :  { %v288_v59 = vadd.f32 %v287_v57, %v286_v56 }
 0x1c2   :  { %v289_v60 = vrot.slane %v288_v59, 4 }
 0x1c4   :  { %v290_v62 = vadd.f32 %v289_v60, %v288_v59 }
 0x1c6   :  { %v291_v63 = vrot.slane %v290_v62, 2 }
 0x1c8   :  { %v292_v1 = vadd.f32 %v291_v63, %v290_v62 }
 0x1ca   :  { %v293_v3 = vrot.slane %v292_v1, 1 }
 0x1cc   :  { %v294_v5 = vadd.f32 %v293_v3, %v292_v1 }
 0x1ce   :  { %v305_v6 = vadd.f32 %v304_v4, %v294_v5 }
 0x1d0   :  { %v335_v7 = vmul.f32 -1.442695, %v305_v6 }
 0x1d2   :  { %390 = vpow2.f32 %v335_v7 }
 0x1df   :  { %v391_v8 = vpop.eup %390 }
 0x1e0   :  { %v309_v9 = vadd.f32 1.0, %v391_v8 }
 0x1e2   :  { %392 = vrcp.f32 %v309_v9 }
 0x1ef   :  { %v393_v10 = vpop.eup %392 }
 0x1f0   :  { %312 = vst [vmem:[#allocation3] sm:$0x1] %v393_v10 }
 0x1f1   :  { %405 = shalt.err (!%p402_p4)
}
 0x1f2   :  { %322 = dma.vmem_to_hbm [thread:$0]  %s320_s29, 16, %s543_s7, [#allocation4]  }
 0x1f3   :  { %414 = dma.done.wait [#allocation4], 16  }
 0x1f4   :  { %415 = vsyncadd [#allocation4], 4294967280 }
 0x1f5   :  { %326 = vsyncpa [#allocation4], 1 }

</bundles_post_ra>
